<compile_context>
chip_gen: v7x
topology: tpu7x:2x2x1
jax: 0.10.0
libtpu: 0.0.40
codegen_flags: <defaults>
</compile_context>

<pallas_src>
import numpy as np
import jax
import jax.numpy as jnp
from jax.experimental import pallas as pl
from jax.experimental.pallas import tpu as pltpu

SUB, LANES = 8, 128
NEG = -1e9  # neutral pad: sigmoid(temp * NEG) == 0 exactly (steepness > 0 assumed)

# TODO(synk): `multi_step_sigmoid` is not defined in the provided source; we use a
# 3-step staircase (mean of shifted sigmoids) as a deterministic stand-in.
_STEP_OFFSETS = (-0.5, 0.0, 0.5)


def _round_up(n, m):
    return -(-n // m) * m


def _fold8(x):
    """Sum an (R,128) block (R a multiple of 8) into one (8,128) vreg with VPU adds."""
    acc = x[0:SUB, :]
    for i in range(SUB, x.shape[0], SUB):
        acc = acc + x[i:i + SUB, :]
    return acc


def _make_kernel(tile_w, chunk, offsets):
    inv_k = 1.0 / float(len(offsets))

    def kernel(n_ref, nc_ref, w_ref, wc_ref, g_ref, gc_ref, out_ref, acc_ref):
        step = pl.program_id(0)

        @pl.when(step == 0)
        def _():
            out_ref[0, 0] = jnp.float32(0.0)
            # Neuron-mask term (tiny, fully resident): mean of shifted sigmoids.
            nx = n_ref[...]
            ns = nc_ref[:, 0:1]                      # lmbda * neuron_mask.lmbda (0 in pad rows)
            nt = nc_ref[:, 1:2]                      # neuron_mask.temp
            mss = jax.nn.sigmoid(nt * (nx - offsets[0]))
            for off in offsets[1:]:
                mss = mss + jax.nn.sigmoid(nt * (nx - off))
            part = _fold8(ns * (mss * inv_k))
            # Norm-weight term (tiny, fully resident): lmbda*|tlmbda| * |w|.
            part = part + _fold8(gc_ref[:, 0:1] * jnp.abs(g_ref[...]))
            acc_ref[...] = part

        # Weight-mask term for this row tile, accumulated chunk-by-chunk so the full
        # (tile_w,128) temporary is never materialized in VMEM.
        partial = None
        for base in range(0, tile_w, chunk):
            x = w_ref[base:base + chunk, :]
            s = wc_ref[base:base + chunk, 0:1]       # lmbda * weight_mask.lmbda (0 in padding)
            t = wc_ref[base:base + chunk, 1:2]       # weight_mask.temp
            p = _fold8(s * jax.nn.sigmoid(x * t))
            partial = p if partial is None else partial + p
        acc_ref[...] += partial

        @pl.when(step == pl.num_programs(0) - 1)
        def _():
            out_ref[0, 0] = jnp.sum(acc_ref[...])    # single cross-lane reduction -> SMEM scalar

    return kernel


def _pack_stream(datas, scales, temps, pad_val):
    """Flatten per-layer tensors into an (R,128) f32 stream plus (R,2) [scale,temp] columns."""
    if not datas:
        return (jnp.zeros((SUB, LANES), jnp.float32),
                np.tile(np.array([[0.0, 1.0]], np.float32), (SUB, 1)))
    d_chunks, c_chunks = [], []
    for d, sc, tp in zip(datas, scales, temps):
        d = jnp.ravel(d).astype(jnp.float32)
        n = int(d.shape[0])
        r = max(1, _round_up(max(n, 1), LANES) // LANES)
        pad = r * LANES - n
        if pad:
            d = jnp.concatenate([d, jnp.full((pad,), pad_val, jnp.float32)])
        d_chunks.append(d.reshape(r, LANES))
        c = np.empty((r, 2), np.float32)
        c[:, 0] = sc
        c[:, 1] = tp
        c_chunks.append(c)
    return jnp.concatenate(d_chunks, axis=0), np.concatenate(c_chunks, axis=0)


def _pad_rows(data, cols, target_rows):
    """Pad a stream with zero-data / zero-scale rows up to `target_rows`."""
    r = int(data.shape[0])
    if r < target_rows:
        extra = target_rows - r
        data = jnp.concatenate([data, jnp.zeros((extra, LANES), jnp.float32)], axis=0)
        cols = np.concatenate(
            [cols, np.tile(np.array([[0.0, 1.0]], np.float32), (extra, 1))], axis=0)
    return data, jnp.asarray(cols)


def penalty_term(layers, lmbda, tlmbda, sparse_f=True):
    """layers: list of dicts with keys
       n_mask, n_lmbda, n_temp, w_mask, w_lmbda, w_temp, norm_w
       (optional bools sparse_neurons / sparse_weights, default True).
       lmbda / tlmbda / temps / layer lambdas are Python floats (as in the torch module)."""
    if not layers:
        return jnp.float32(0.0)

    lmbda = float(lmbda)
    g_scale = lmbda * abs(float(tlmbda))

    n_d, n_s, n_t = [], [], []
    w_d, w_s, w_t = [], [], []
    g_d, g_s = [], []
    for lyr in layers:
        if lyr.get("sparse_neurons", True):
            n_d.append(lyr["n_mask"])
            n_s.append(lmbda * float(lyr["n_lmbda"]))
            n_t.append(float(lyr["n_temp"]))
        if lyr.get("sparse_weights", True):
            w_d.append(lyr["w_mask"])
            w_s.append(lmbda * float(lyr["w_lmbda"]))
            w_t.append(float(lyr["w_temp"]))
        if sparse_f:
            g_d.append(lyr["norm_w"])
            g_s.append(g_scale)

    n_data, n_cols = _pack_stream(n_d, n_s, n_t, NEG)
    w_data, w_cols = _pack_stream(w_d, w_s, w_t, NEG)
    g_data, g_cols = _pack_stream(g_d, g_s, [1.0] * len(g_d), 0.0)

    # Tiny resident sections: pad to whole (8,128) tiles.
    # TODO(synk): for models with millions of channels, tile these over the grid too.
    n_data, n_cols = _pad_rows(n_data, n_cols, _round_up(int(n_data.shape[0]), SUB))
    g_data, g_cols = _pad_rows(g_data, g_cols, _round_up(int(g_data.shape[0]), SUB))

    # Dominant weight-mask section: row-tiled over the grid so DMA overlaps compute.
    rw_raw = int(w_data.shape[0])
    tile_w = 512 if rw_raw >= 512 else _round_up(rw_raw, SUB)   # 512x128 f32 = 256 KiB / buffer
    rw = _round_up(rw_raw, tile_w)
    w_data, w_cols = _pad_rows(w_data, w_cols, rw)
    chunk = 64 if tile_w % 64 == 0 else SUB
    n_steps = rw // tile_w

    rn, rg = int(n_data.shape[0]), int(g_data.shape[0])

    out = pl.pallas_call(
        _make_kernel(tile_w, chunk, _STEP_OFFSETS),
        out_shape=jax.ShapeDtypeStruct((1, 1), jnp.float32),
        grid=(n_steps,),
        in_specs=[
            pl.BlockSpec((rn, LANES), lambda i: (0, 0)),      # neuron data  (resident)
            pl.BlockSpec((rn, 2), lambda i: (0, 0)),          # neuron [scale, temp]
            pl.BlockSpec((tile_w, LANES), lambda i: (i, 0)),  # weight data  (tiled)
            pl.BlockSpec((tile_w, 2), lambda i: (i, 0)),      # weight [scale, temp]
            pl.BlockSpec((rg, LANES), lambda i: (0, 0)),      # norm data    (resident)
            pl.BlockSpec((rg, 2), lambda i: (0, 0)),          # norm [scale, 1]
        ],
        out_specs=pl.BlockSpec(memory_space=pltpu.SMEM),
        scratch_shapes=[pltpu.VMEM((SUB, LANES), jnp.float32)],
        compiler_params=pltpu.CompilerParams(dimension_semantics=("arbitrary",)),
    )(n_data, n_cols, w_data, w_cols, g_data, g_cols)
    return out[0, 0]


# ----------------------------- pure-JAX reference -----------------------------

def _multi_step_sigmoid_ref(x, steepness):
    acc = jnp.zeros_like(x)
    for off in _STEP_OFFSETS:
        acc = acc + jax.nn.sigmoid(steepness * (x - off))
    return acc / float(len(_STEP_OFFSETS))


def penalty_term_reference(layers, lmbda, tlmbda, sparse_f=True):
    loss = jnp.float32(0.0)
    for lyr in layers:
        if lyr.get("sparse_neurons", True):
            loss = loss + (lmbda * lyr["n_lmbda"]
                           * _multi_step_sigmoid_ref(lyr["n_mask"], lyr["n_temp"])).sum()
        if lyr.get("sparse_weights", True):
            loss = loss + (lmbda * lyr["w_lmbda"]
                           * jax.nn.sigmoid(lyr["w_mask"] * lyr["w_temp"])).sum()
        if sparse_f:
            loss = loss + lmbda * jnp.abs(tlmbda * lyr["norm_w"]).sum()
    return loss


if __name__ == "__main__":
    key = jax.random.PRNGKey(0)
    num_layers, c_out, c_in, k = 3, 8, 4, 3
    lmbda, tlmbda = 1e-3, 0.5

    layers = []
    for i in range(num_layers):
        key, k1, k2, k3 = jax.random.split(key, 4)
        layers.append(dict(
            n_mask=jax.random.normal(k1, (c_out,), jnp.float32),             # neuron_mask.mask_value
            n_lmbda=0.1 * (i + 1),
            n_temp=4.0,
            w_mask=jax.random.normal(k2, (c_out, c_in, k, k), jnp.float32),  # weight_mask.mask_value
            w_lmbda=0.05 * (i + 1),
            w_temp=2.0,
            norm_w=jax.random.normal(k3, (c_out,), jnp.float32),             # norm.weight
        ))

    loss = jax.block_until_ready(penalty_term(layers, lmbda, tlmbda))
    ref = jax.block_until_ready(penalty_term_reference(layers, lmbda, tlmbda))
    np.testing.assert_allclose(np.asarray(loss), np.asarray(ref), rtol=1e-5, atol=1e-6)
    print("KERNEL_OK")
</pallas_src>

<mosaic_0001>
module attributes {stable_mosaic.version = 11 : i64} {
  func.func @kernel(%arg0: i32, %arg1: memref<8x128xf32, #tpu.memory_space<vmem>>, %arg2: memref<8x2xf32, #tpu.memory_space<vmem>>, %arg3: memref<16x128xf32, #tpu.memory_space<vmem>>, %arg4: memref<16x2xf32, #tpu.memory_space<vmem>>, %arg5: memref<8x128xf32, #tpu.memory_space<vmem>>, %arg6: memref<8x2xf32, #tpu.memory_space<vmem>>, %arg7: memref<1x1xf32, #tpu.memory_space<smem>>, %arg8: memref<8x128xf32, #tpu.memory_space<vmem>>) attributes {dimension_semantics = [#tpu.dimension_semantics<arbitrary>], iteration_bounds = array<i64: 1>, scalar_prefetch = 0 : i64, scratch_operands = 1 : i64, tpu.core_type = #tpu.core_type<tc>, window_params = [{pipeline_mode = #tpu.pipeline_mode<synchronous>, transform_indices = @transform_0, window_bounds = array<i64: 8, 128>}, {pipeline_mode = #tpu.pipeline_mode<synchronous>, transform_indices = @transform_1, window_bounds = array<i64: 8, 2>}, {transform_indices = @transform_2, window_bounds = array<i64: 16, 128>}, {transform_indices = @transform_3, window_bounds = array<i64: 16, 2>}, {pipeline_mode = #tpu.pipeline_mode<synchronous>, transform_indices = @transform_4, window_bounds = array<i64: 8, 128>}, {pipeline_mode = #tpu.pipeline_mode<synchronous>, transform_indices = @transform_5, window_bounds = array<i64: 8, 2>}, {transform_indices = @transform_6, window_bounds = array<i64: 1, 1>}]} {
    %c0_i32 = arith.constant 0 : i32
    %0 = arith.cmpi eq, %arg0, %c0_i32 : i32
    %1 = arith.extui %0 : i1 to i32
    %c0_i32_0 = arith.constant 0 : i32
    %2 = arith.cmpi ne, %1, %c0_i32_0 : i32
    scf.if %2 {
      %cst_17 = arith.constant 0.000000e+00 : f32
      %c0_18 = arith.constant 0 : index
      %c0_19 = arith.constant 0 : index
      %34 = memref.load %arg7[%c0_18, %c0_19] : memref<1x1xf32, #tpu.memory_space<smem>>
      memref.store %cst_17, %arg7[%c0_18, %c0_19] : memref<1x1xf32, #tpu.memory_space<smem>>
      %c0_20 = arith.constant 0 : index
      %c0_21 = arith.constant 0 : index
      %35 = vector.load %arg1[%c0_20, %c0_21] : memref<8x128xf32, #tpu.memory_space<vmem>>, vector<8x128xf32>
      %c0_22 = arith.constant 0 : index
      %c0_23 = arith.constant 0 : index
      %36 = vector.load %arg2[%c0_22, %c0_23] : memref<8x2xf32, #tpu.memory_space<vmem>>, vector<8x1xf32>
      %c0_24 = arith.constant 0 : index
      %c1_25 = arith.constant 1 : index
      %37 = vector.load %arg2[%c0_24, %c1_25] : memref<8x2xf32, #tpu.memory_space<vmem>>, vector<8x1xf32>
      %cst_26 = arith.constant -5.000000e-01 : f32
      %38 = vector.broadcast %cst_26 : f32 to vector<8x128xf32>
      %39 = arith.subf %35, %38 : vector<8x128xf32>
      %40 = vector.broadcast %37 : vector<8x1xf32> to vector<8x128xf32>
      %41 = arith.mulf %40, %39 : vector<8x128xf32>
      %42 = arith.negf %41 : vector<8x128xf32>
      %43 = math.exp %42 : vector<8x128xf32>
      %cst_27 = arith.constant 1.000000e+00 : f32
      %44 = vector.broadcast %cst_27 : f32 to vector<8x128xf32>
      %45 = arith.addf %44, %43 : vector<8x128xf32>
      %46 = arith.divf %44, %45 : vector<8x128xf32>
      %cst_28 = arith.constant 0.000000e+00 : f32
      %47 = vector.broadcast %cst_28 : f32 to vector<8x128xf32>
      %48 = arith.subf %35, %47 : vector<8x128xf32>
      %49 = vector.broadcast %37 : vector<8x1xf32> to vector<8x128xf32>
      %50 = arith.mulf %49, %48 : vector<8x128xf32>
      %51 = arith.negf %50 : vector<8x128xf32>
      %52 = math.exp %51 : vector<8x128xf32>
      %cst_29 = arith.constant 1.000000e+00 : f32
      %53 = vector.broadcast %cst_29 : f32 to vector<8x128xf32>
      %54 = arith.addf %53, %52 : vector<8x128xf32>
      %55 = arith.divf %53, %54 : vector<8x128xf32>
      %56 = arith.addf %46, %55 : vector<8x128xf32>
      %cst_30 = arith.constant 5.000000e-01 : f32
      %57 = vector.broadcast %cst_30 : f32 to vector<8x128xf32>
      %58 = arith.subf %35, %57 : vector<8x128xf32>
      %59 = vector.broadcast %37 : vector<8x1xf32> to vector<8x128xf32>
      %60 = arith.mulf %59, %58 : vector<8x128xf32>
      %61 = arith.negf %60 : vector<8x128xf32>
      %62 = math.exp %61 : vector<8x128xf32>
      %cst_31 = arith.constant 1.000000e+00 : f32
      %63 = vector.broadcast %cst_31 : f32 to vector<8x128xf32>
      %64 = arith.addf %63, %62 : vector<8x128xf32>
      %65 = arith.divf %63, %64 : vector<8x128xf32>
      %66 = arith.addf %56, %65 : vector<8x128xf32>
      %cst_32 = arith.constant 0.333333343 : f32
      %67 = vector.broadcast %cst_32 : f32 to vector<8x128xf32>
      %68 = arith.mulf %66, %67 : vector<8x128xf32>
      %69 = vector.broadcast %36 : vector<8x1xf32> to vector<8x128xf32>
      %70 = arith.mulf %69, %68 : vector<8x128xf32>
      %c0_33 = arith.constant 0 : index
      %c0_34 = arith.constant 0 : index
      %71 = vector.load %arg6[%c0_33, %c0_34] : memref<8x2xf32, #tpu.memory_space<vmem>>, vector<8x1xf32>
      %c0_35 = arith.constant 0 : index
      %c0_36 = arith.constant 0 : index
      %72 = vector.load %arg5[%c0_35, %c0_36] : memref<8x128xf32, #tpu.memory_space<vmem>>, vector<8x128xf32>
      %73 = math.absf %72 : vector<8x128xf32>
      %74 = vector.broadcast %71 : vector<8x1xf32> to vector<8x128xf32>
      %75 = arith.mulf %74, %73 : vector<8x128xf32>
      %76 = arith.addf %70, %75 : vector<8x128xf32>
      %c0_37 = arith.constant 0 : index
      %c0_38 = arith.constant 0 : index
      %77 = vector.load %arg8[%c0_37, %c0_38] : memref<8x128xf32, #tpu.memory_space<vmem>>, vector<8x128xf32>
      tpu.vector_store %arg8[%c0_37, %c0_38], %76 {strides = array<i32>} : memref<8x128xf32, #tpu.memory_space<vmem>>, vector<8x128xf32>,
    } else {
    }
    %c0 = arith.constant 0 : index
    %c0_1 = arith.constant 0 : index
    %3 = vector.load %arg3[%c0, %c0_1] : memref<16x128xf32, #tpu.memory_space<vmem>>, vector<8x128xf32>
    %c0_2 = arith.constant 0 : index
    %c0_3 = arith.constant 0 : index
    %4 = vector.load %arg4[%c0_2, %c0_3] : memref<16x2xf32, #tpu.memory_space<vmem>>, vector<8x1xf32>
    %c0_4 = arith.constant 0 : index
    %c1 = arith.constant 1 : index
    %5 = vector.load %arg4[%c0_4, %c1] : memref<16x2xf32, #tpu.memory_space<vmem>>, vector<8x1xf32>
    %6 = vector.broadcast %5 : vector<8x1xf32> to vector<8x128xf32>
    %7 = arith.mulf %3, %6 : vector<8x128xf32>
    %8 = arith.negf %7 : vector<8x128xf32>
    %9 = math.exp %8 : vector<8x128xf32>
    %cst = arith.constant 1.000000e+00 : f32
    %10 = vector.broadcast %cst : f32 to vector<8x128xf32>
    %11 = arith.addf %10, %9 : vector<8x128xf32>
    %12 = arith.divf %10, %11 : vector<8x128xf32>
    %13 = vector.broadcast %4 : vector<8x1xf32> to vector<8x128xf32>
    %14 = arith.mulf %13, %12 : vector<8x128xf32>
    %c8 = arith.constant 8 : index
    %c0_5 = arith.constant 0 : index
    %15 = vector.load %arg3[%c8, %c0_5] : memref<16x128xf32, #tpu.memory_space<vmem>>, vector<8x128xf32>
    %c8_6 = arith.constant 8 : index
    %c0_7 = arith.constant 0 : index
    %16 = vector.load %arg4[%c8_6, %c0_7] : memref<16x2xf32, #tpu.memory_space<vmem>>, vector<8x1xf32>
    %c8_8 = arith.constant 8 : index
    %c1_9 = arith.constant 1 : index
    %17 = vector.load %arg4[%c8_8, %c1_9] : memref<16x2xf32, #tpu.memory_space<vmem>>, vector<8x1xf32>
    %18 = vector.broadcast %17 : vector<8x1xf32> to vector<8x128xf32>
    %19 = arith.mulf %15, %18 : vector<8x128xf32>
    %20 = arith.negf %19 : vector<8x128xf32>
    %21 = math.exp %20 : vector<8x128xf32>
    %cst_10 = arith.constant 1.000000e+00 : f32
    %22 = vector.broadcast %cst_10 : f32 to vector<8x128xf32>
    %23 = arith.addf %22, %21 : vector<8x128xf32>
    %24 = arith.divf %22, %23 : vector<8x128xf32>
    %25 = vector.broadcast %16 : vector<8x1xf32> to vector<8x128xf32>
    %26 = arith.mulf %25, %24 : vector<8x128xf32>
    %27 = arith.addf %14, %26 : vector<8x128xf32>
    %c0_11 = arith.constant 0 : index
    %c0_12 = arith.constant 0 : index
    %28 = vector.load %arg8[%c0_11, %c0_12] : memref<8x128xf32, #tpu.memory_space<vmem>>, vector<8x128xf32>
    %29 = arith.addf %28, %27 : vector<8x128xf32>
    %c0_13 = arith.constant 0 : index
    %c0_14 = arith.constant 0 : index
    %30 = vector.load %arg8[%c0_13, %c0_14] : memref<8x128xf32, #tpu.memory_space<vmem>>, vector<8x128xf32>
    tpu.vector_store %arg8[%c0_13, %c0_14], %29 {strides = array<i32>} : memref<8x128xf32, #tpu.memory_space<vmem>>, vector<8x128xf32>,
    %c0_i32_15 = arith.constant 0 : i32
    %31 = arith.cmpi eq, %arg0, %c0_i32_15 : i32
    %32 = arith.extui %31 : i1 to i32
    %c0_i32_16 = arith.constant 0 : i32
    %33 = arith.cmpi ne, %32, %c0_i32_16 : i32
    scf.if %33 {
      %c0_17 = arith.constant 0 : index
      %c0_18 = arith.constant 0 : index
      %34 = vector.load %arg8[%c0_17, %c0_18] : memref<8x128xf32, #tpu.memory_space<vmem>>, vector<8x128xf32>
      %35 = vector.shape_cast %34 : vector<8x128xf32> to vector<1x8x128xf32>
      %cst_19 = arith.constant dense<0.000000e+00> : vector<1xf32>
      %36 = vector.multi_reduction <add>, %35, %cst_19 [1, 2] : vector<1x8x128xf32> to vector<1xf32>
      %37 = vector.shape_cast %36 : vector<1xf32> to vector<1x1x1xf32>
      %38 = vector.extract %37[0, 0, 0] : f32 from vector<1x1x1xf32>
      %c0_20 = arith.constant 0 : index
      %c0_21 = arith.constant 0 : index
      %39 = memref.load %arg7[%c0_20, %c0_21] : memref<1x1xf32, #tpu.memory_space<smem>>
      memref.store %38, %arg7[%c0_20, %c0_21] : memref<1x1xf32, #tpu.memory_space<smem>>
    } else {
    }
    return
  }
  func.func @transform_0(%arg0: i32) -> (i32, i32) {
    %c0_i32 = arith.constant 0 : i32
    %c0_i32_0 = arith.constant 0 : i32
    %c0_i32_1 = arith.constant 0 : i32
    return %c0_i32, %c0_i32_0 : i32, i32
  }
  func.func @transform_1(%arg0: i32) -> (i32, i32) {
    %c0_i32 = arith.constant 0 : i32
    %c0_i32_0 = arith.constant 0 : i32
    %c0_i32_1 = arith.constant 0 : i32
    return %c0_i32, %c0_i32_0 : i32, i32
  }
  func.func @transform_2(%arg0: i32) -> (i32, i32) {
    %c0_i32 = arith.constant 0 : i32
    %c0_i32_0 = arith.constant 0 : i32
    return %arg0, %c0_i32 : i32, i32
  }
  func.func @transform_3(%arg0: i32) -> (i32, i32) {
    %c0_i32 = arith.constant 0 : i32
    %c0_i32_0 = arith.constant 0 : i32
    return %arg0, %c0_i32 : i32, i32
  }
  func.func @transform_4(%arg0: i32) -> (i32, i32) {
    %c0_i32 = arith.constant 0 : i32
    %c0_i32_0 = arith.constant 0 : i32
    %c0_i32_1 = arith.constant 0 : i32
    return %c0_i32, %c0_i32_0 : i32, i32
  }
  func.func @transform_5(%arg0: i32) -> (i32, i32) {
    %c0_i32 = arith.constant 0 : i32
    %c0_i32_0 = arith.constant 0 : i32
    %c0_i32_1 = arith.constant 0 : i32
    return %c0_i32, %c0_i32_0 : i32, i32
  }
  func.func @transform_6(%arg0: i32) -> (i32, i32) {
    %c0_i32 = arith.constant 0 : i32
    %c0_i32_0 = arith.constant 0 : i32
    %c0_i32_1 = arith.constant 0 : i32
    return %c0_i32, %c0_i32_0 : i32, i32
  }
}

</mosaic_0001>

<bundles_post_ra>
// kernel: tpu_custom_call.1
= control target key start
LH: loop header
LB: loop body
LE: loop exit
PB: predicated region body
PF: predicated region fallthrough
CT: control target
= control target key end

     0   :  { %v198_v2 = vmov 1   ;;  %s272_s0 = inlined_call_operand.vmem [shape: f32[8,128], index: 0, kind: input, shape index: {}]   ;;  %s273_s1 = inlined_call_operand.vmem [shape: f32[8,2], index: 1, kind: input, shape index: {}]   ;;  %s274_s2 = inlined_call_operand.vmem [shape: f32[16,128], index: 2, kind: input, shape index: {}]   ;;  %s275_s3 = inlined_call_operand.vmem [shape: f32[16,2], index: 3, kind: input, shape index: {}]   ;;  %s276_s4 = inlined_call_operand.vmem [shape: f32[8,128], index: 4, kind: input, shape index: {}]   ;;  %s277_s5 = inlined_call_operand.vmem [shape: f32[8,2], index: 5, kind: input, shape index: {}]   ;;  %s278_s6 = inlined_call_operand.hbm [shape: f32[1,1], index: 6, kind: output, shape index: {}]  }
   0x1   :  { %v99_v0 = vld [vmem:[%s275_s3 + $0x8] sm:$0xff]  ;;  %v31_v1 = vld [vmem:[%s273_s1] sm:$0xff]  ;;  %163 = vset.pattern.permute.xlu1 %v198_v2  ;;  %162 = vset.pattern.permute.xlu0 %v198_v2 }
   0x2   :  { %102 = vperm.xlu1 %163, %v99_v0   ;;  %35 = vperm.xlu0 %162, %v31_v1  }
   0x3   :  { %11 = vsyncpa [#allocation4], 0  ;;  %v80_v3 = vld [vmem:[%s275_s3] sm:$0xff]  ;;  %v199_v4 = vmov 0   ;;  %v98_v9 = vld [vmem:[%s274_s2 + $0x8] sm:$0xff]  ;;  %s186_s10 = scalar_lea.hbm %s278_s6, 16 }
   0x4   :  { %v68_v5 = vld [vmem:[%s277_s5] sm:$0xff]  ;;  %p187_p0 = scmp.ne.s32.totalorder %s278_s6, %s186_s10  ;;  %p190_p1 = scmp.lt.u32.totalorder %s186_s10, %s278_s6 }
   0x5   :  { %v30_v6 = vld [vmem:[%s272_s0] sm:$0xff] }
   0x6   :  { %83 = vperm.xlu0 %162, %v80_v3   ;;  %164 = vset.pattern.permute.xlu1 %v199_v4  ;;  %v149_v7 = vadd.f32 0.5, %v30_v6  ;;  %v152_v8 = vadd.f32 -0.5, %v30_v6  ;;  %v79_v16 = vld [vmem:[%s274_s2] sm:$0xff]  ;;  %p192_p2 = pnand %p190_p1, %p187_p0 }
   0x7   :  { %64 = vperm.xlu1 %164, %v31_v1   ;;  %v69_v35 = vld [vmem:[%s276_s4] sm:$0xff] }
   0x8   :  { %v70_v41 = vand.u32 2147483647, %v69_v35 }
   0xa   :  { %165 = vset.pattern.permute.xlu0 %v199_v4 }
   0xb   :  { %94 = vperm.xlu1 %164, %v80_v3   ;;  %73 = vperm.xlu0 %165, %v68_v5  }
   0xf   :  { %113 = vperm.xlu1 %164, %v99_v0  }
  0x81   :  { %v103_v10 = vpop.permute.xlu1 %102  ;;  %v36_v11 = vpop.permute.xlu0 %35 }
  0x82   :  { %v105_v12 = vmul.f32 %v103_v10, %v98_v9  ;;  %v38_v13 = vmul.f32 %v149_v7, %v36_v11  ;;  %v45_v14 = vmul.f32 %v36_v11, %v30_v6  ;;  %v54_v15 = vmul.f32 %v152_v8, %v36_v11 }
  0x84   :  { %v155_v17 = vmul.f32 -1.442695, %v105_v12  ;;  %v150_v18 = vmul.f32 -1.442695, %v38_v13  ;;  %v151_v19 = vmul.f32 -1.442695, %v45_v14 }
  0x85   :  { %v153_v20 = vmul.f32 -1.442695, %v54_v15  ;;  %v84_v21 = vpop.permute.xlu0 %83 }
  0x86   :  { %166 = vpow2.f32 %v155_v17  ;;  %v86_v22 = vmul.f32 %v84_v21, %v79_v16  ;;  %v65_v34 = vpop.permute.xlu1 %64 }
  0x87   :  { %168 = vpow2.f32 %v150_v18 }
  0x88   :  { %170 = vpow2.f32 %v151_v19  ;;  %v154_v23 = vmul.f32 -1.442695, %v86_v22 }
  0x89   :  { %172 = vpow2.f32 %v153_v20 }
  0x8a   :  { %174 = vpow2.f32 %v154_v23  ;;  %v95_v38 = vpop.permute.xlu1 %94  ;;  %v74_v43 = vpop.permute.xlu0 %73 }
  0x8b   :  { %v76_v48 = vmul.f32 %v74_v43, %v70_v41 }
  0x8e   :  { %v114_v49 = vpop.permute.xlu1 %113 }
  0x90   :  { %v167_v24 = vpop.eup %166 }
  0x91   :  { %v169_v25 = vpop.eup %168  ;;  %v109_v32 = vadd.f32 1.0, %v167_v24 }
  0x92   :  { %v171_v26 = vpop.eup %170  ;;  %v42_v27 = vadd.f32 1.0, %v169_v25 }
  0x93   :  { %v173_v28 = vpop.eup %172  ;;  %v49_v29 = vadd.f32 1.0, %v171_v26 }
  0x94   :  { %v175_v30 = vpop.eup %174  ;;  %176 = vrcp.f32 %v42_v27  ;;  %v58_v31 = vadd.f32 1.0, %v173_v28 }
  0x95   :  { %178 = vrcp.f32 %v49_v29  ;;  %v90_v33 = vadd.f32 1.0, %v175_v30 }
  0x96   :  { %180 = vrcp.f32 %v58_v31 }
  0x97   :  { %182 = vrcp.f32 %v90_v33 }
  0x98   :  { %184 = vrcp.f32 %v109_v32 }
  0x9e   :  { %v177_v36 = vpop.eup %176 }
  0x9f   :  { %v179_v37 = vpop.eup %178 }
  0xa0   :  { %v181_v39 = vpop.eup %180  ;;  %v52_v40 = vadd.f32 %v179_v37, %v177_v36 }
  0xa1   :  { %v183_v42 = vpop.eup %182 }
  0xa2   :  { %v61_v44 = vadd.f32 %v181_v39, %v52_v40  ;;  %v185_v45 = vpop.eup %184  ;;  %v97_v47 = vmul.f32 %v183_v42, %v95_v38 }
  0xa3   :  { %v116_v51 = vmul.f32 %v185_v45, %v114_v49 }
  0xa4   :  { %v62_v46 = vmul.f32 0.33333334, %v61_v44 }
  0xa5   :  { %v117_v52 = vadd.f32 %v116_v51, %v97_v47 }
  0xa6   :  { %v67_v50 = vmul.f32 %v65_v34, %v62_v46 }
  0xa8   :  { %v77_v53 = vadd.f32 %v76_v48, %v67_v50 }
  0xaa   :  { %v119_v54 = vadd.f32 %v117_v52, %v77_v53 }
  0xac   :  { %125 = vadd.xlane.f32.xlu0 %v119_v54 }
 0x139   :  { %v126_v55 = vpop.xlane.xlu0 %125 }
 0x13a   :  { %v127_v56 = vrot.slane %v126_v55, 4 }
 0x13c   :  { %v128_v57 = vadd.f32 %v127_v56, %v126_v55 }
 0x13e   :  { %v129_v58 = vrot.slane %v128_v57, 2 }
 0x140   :  { %v130_v59 = vadd.f32 %v129_v58, %v128_v57 }
 0x142   :  { %v131_v60 = vrot.slane %v130_v59, 1 }
 0x144   :  { %v132_v61 = vadd.f32 %v131_v60, %v130_v59 }
 0x146   :  { %156 = vpush %v132_v61 }
 0x177   :  { %s157_s4 = spop %156 }
 0x178   :  { %135 = sst [smem:[#allocation3]] %s157_s4 }
 0x179   :  { %195 = shalt.err (!%p192_p2)
}
 0x17a   :  { %s200_s15 = smov [#allocation3]  }
 0x17b   :  { %143 = dma.smem_to_hbm %s200_s15, 16, %s278_s6, [#allocation4]  }
 0x17c   :  { %196 = dma.done.wait [#allocation4], 16  }
 0x17d   :  { %197 = vsyncadd [#allocation4], 4294967280 }
 0x17e   :  { %147 = sfence }
 0x17f   :  { %148 = vsyncpa [#allocation4], 1 }

</bundles_post_ra>
